<compile_context>
chip_gen: v6e
topology: v6e:2x2x1
jax: 0.10.0
libtpu: 0.0.40
codegen_flags: <defaults>
</compile_context>

<pallas_src>
import functools

import numpy as np

import jax
import jax.numpy as jnp
from jax.experimental import pallas as pl
from jax.experimental.pallas import tpu as pltpu


# --------------------------------------------------------------------------
# Constant operand construction (cached; numpy so it is never re-traced).
# --------------------------------------------------------------------------
@functools.lru_cache(maxsize=None)
def _fused_dft_matrix(h, w):
    """Fused cos/sin operator for the shifted+cropped ortho-DFT magnitude.

    Returns (mat, hc, wc, r) with mat of shape (h*w, 2*r):
      cols [0, hc*wc)      -> cos columns (Re part)
      cols [r, r + hc*wc)  -> sin columns (Im part, sign irrelevant for |.|)
      remaining cols       -> zero padding (r is a multiple of 128 so the
                              output lane axis stays 128-aligned / unmasked)
    Rows are pixels in row-major order (m*W + n), matching x.reshape(B, H*W).
    Built from separable factors: no dense float64 (Hc,Wc,H,W) intermediate.
    """
    st_h = h // 4 + 1
    end_h = h - st_h + 1
    st_w = w // 4 + 1
    end_w = w - st_w + 1
    hc = end_h - st_h
    wc = end_w - st_w

    # fftshift: output position p holds frequency (p - n//2) mod n.
    kk = ((np.arange(h) - h // 2) % h)[st_h:end_h]          # (Hc,)
    ll = ((np.arange(w) - w // 2) % w)[st_w:end_w]          # (Wc,)
    m = np.arange(h)
    nn = np.arange(w)

    # Integer modular reduction keeps phases exact for large H, W.
    ph = ((kk[:, None] * m[None, :]) % h).astype(np.float64) / h    # (Hc, H)
    pw = ((ll[:, None] * nn[None, :]) % w).astype(np.float64) / w   # (Wc, W)

    scale = 1.0 / np.sqrt(float(h * w))       # 'ortho' norm, folded into H factors
    ch = (np.cos(2.0 * np.pi * ph) * scale).astype(np.float32)      # (Hc, H)
    sh = (np.sin(2.0 * np.pi * ph) * scale).astype(np.float32)
    cw = np.cos(2.0 * np.pi * pw).astype(np.float32)                # (Wc, W)
    sw = np.sin(2.0 * np.pi * pw).astype(np.float32)

    # cos(a+b) = ca*cb - sa*sb ; sin(a+b) = sa*cb + ca*sb   (separable build)
    cos_t = np.einsum("km,ln->mnkl", ch, cw) - np.einsum("km,ln->mnkl", sh, sw)
    sin_t = np.einsum("km,ln->mnkl", sh, cw) + np.einsum("km,ln->mnkl", ch, sw)
    cos_t = cos_t.reshape(h * w, hc * wc)
    sin_t = sin_t.reshape(h * w, hc * wc)

    r = ((hc * wc + 127) // 128) * 128        # lane-aligned output width
    mat = np.zeros((h * w, 2 * r), dtype=np.float32)
    mat[:, :hc * wc] = cos_t
    mat[:, r:r + hc * wc] = sin_t
    return mat, hc, wc, r


@functools.lru_cache(maxsize=None)
def _fused_dft_operator_device(h, w):
    """Device-resident cached operator: uploaded once per (H, W)."""
    mat_np, hc, wc, r = _fused_dft_matrix(h, w)
    return jax.device_put(mat_np), hc, wc, r


@functools.lru_cache(maxsize=None)
def _vmem_budget_bytes():
    """~75% of per-core VMEM (96 MiB on v5e/v6e, 48 MiB on v7x)."""
    try:
        cap = int(pltpu.get_tpu_info().vmem_capacity_bytes)
    except Exception:
        cap = 64 * 1024 * 1024          # conservative fallback
    return (cap * 3) // 4


def _choose_batch_tiling(b, hw, r, vmem_for_blocks):
    """Pick (BT, B_pad): images per grid step and padded batch size.

    vmem_for_blocks: VMEM bytes left after the resident operator.
    Per-image f32 bytes per step: double-buffered input row (2*HW),
    double-buffered output row (2*R), ~4*R for matmul result / magnitude temps.
    """
    per_img = 4 * (2 * hw + 6 * r)
    cap = max(8, vmem_for_blocks // max(per_img, 1))
    if b <= cap:
        if b >= 512:
            # Keep >= 2 even "parallel" grid steps so both v7x TensorCores work.
            bt = (((b + 1) // 2 + 7) // 8) * 8
            return bt, 2 * bt
        # Single grid step: block dims equal full array dims -> no alignment
        # requirement, no padding waste.
        return b, b
    bt = max(8, (cap // 8) * 8)          # batch lives on sublanes -> 8-aligned
    b_pad = ((b + bt - 1) // bt) * bt
    return bt, b_pad


# --------------------------------------------------------------------------
# Kernel: one MXU matmul + magnitude.  Output lanes = R (128-aligned).
# --------------------------------------------------------------------------
def _fftpool_kernel(mat_ref, x_ref, o_ref):
    # mat_ref: (HW, 2R)  fused cos/sin operator, single VMEM-resident copy
    # x_ref:   (BT, HW)  BT images, one per sublane row
    # o_ref:   (BT, R)   magnitudes (cols >= Hc*Wc are zero padding)
    r = o_ref.shape[1]
    v = jnp.dot(x_ref[...], mat_ref[...],
                preferred_element_type=jnp.float32)          # (BT, 2R)
    re = v[:, :r]
    im = v[:, r:]
    # |X| = sqrt(Re^2 + Im^2); values are O(1) under 'ortho' norm.
    o_ref[...] = jnp.sqrt(re * re + im * im)


# --------------------------------------------------------------------------
# Wrapper
# --------------------------------------------------------------------------
def fft_pool(x):
    """x: (N, C, H, W) real array. Returns (N, C, Hc, Wc) float32 magnitudes."""
    n, c, h, w = x.shape
    hw = h * w
    b = n * c

    mat, hc, wc, r = _fused_dft_operator_device(h, w)        # (HW, 2R)
    mat_bytes = hw * 2 * r * 4
    budget = _vmem_budget_bytes()

    if mat_bytes > budget - (2 << 20):
        # Fused operator too large to stay VMEM-resident (e.g. big H*W on
        # v7x's 64 MiB VMEM): degrade gracefully to the XLA FFT path.
        # TODO(synk): separable two-stage Pallas kernel for large spatial dims.
        return _reference(x).astype(jnp.float32)

    bt, b_pad = _choose_batch_tiling(b, hw, r, budget - mat_bytes)

    # Batch on sublanes; no transpose needed in either direction.
    xb = x.reshape(b, hw).astype(jnp.float32)
    if b_pad > b:
        xb = jnp.pad(xb, ((0, b_pad - b), (0, 0)))

    grid = (b_pad // bt,)

    out = pl.pallas_call(
        _fftpool_kernel,
        out_shape=jax.ShapeDtypeStruct((b_pad, r), jnp.float32),
        grid_spec=pltpu.PrefetchScalarGridSpec(
            num_scalar_prefetch=0,
            grid=grid,
            in_specs=[
                # Whole operator resident in VMEM: one copy, no double buffer.
                pl.BlockSpec(memory_space=pltpu.MemorySpace.VMEM),
                # BT images per step along the sublane (batch) axis.
                pl.BlockSpec((bt, hw), lambda i: (i, 0)),
            ],
            out_specs=pl.BlockSpec((bt, r), lambda i: (i, 0)),
        ),
        compiler_params=pltpu.CompilerParams(
            dimension_semantics=("parallel",),
            vmem_limit_bytes=budget,
        ),
        cost_estimate=pl.CostEstimate(
            flops=2 * b_pad * hw * (2 * r) + 4 * b_pad * r,
            transcendentals=0,
            bytes_accessed=mat_bytes + 4 * b_pad * (hw + r),
        ),
    )(mat, xb)

    # Layout plumbing back to (N, C, Hc, Wc): drop batch/lane padding and
    # reshape.  No transpose, pure XLA, tiny output.
    res = out[:b, :hc * wc]                   # (B, Hc*Wc)
    return res.reshape(n, c, hc, wc)


# --------------------------------------------------------------------------
# Pure-JAX reference matching the PyTorch forward (also the large-H*W fallback).
# --------------------------------------------------------------------------
def _reference(x):
    out = jnp.fft.fft2(x, norm="ortho")
    out = jnp.fft.fftshift(jnp.fft.fftshift(out, axes=-1), axes=-2)
    h, w = out.shape[-2], out.shape[-1]
    st_h = h // 4 + 1
    end_h = h - st_h + 1
    st_w = w // 4 + 1
    end_w = w - st_w + 1
    out = out[..., st_h:end_h, st_w:end_w]
    return jnp.abs(out)


if __name__ == "__main__":
    key = jax.random.PRNGKey(0)
    x = jax.random.normal(key, (2, 4, 16, 16), dtype=jnp.float32)

    y = fft_pool(x)
    y = jax.block_until_ready(y)

    y_ref = _reference(x)
    assert y.shape == (2, 4, 7, 7), y.shape
    err = float(jnp.max(jnp.abs(y - y_ref)))
    assert jnp.allclose(y, y_ref, atol=5e-4, rtol=5e-4), err

    print("KERNEL_OK")
</pallas_src>

<mosaic_0001>
module attributes {stable_mosaic.version = 11 : i64} {
  func.func @_fftpool_kernel(%arg0: i32, %arg1: memref<256x256xf32, #tpu.memory_space<vmem>>, %arg2: memref<8x256xf32, #tpu.memory_space<vmem>>, %arg3: memref<8x128xf32, #tpu.memory_space<vmem>>) attributes {dimension_semantics = [#tpu.dimension_semantics<parallel>], iteration_bounds = array<i64: 1>, scalar_prefetch = 0 : i64, scratch_operands = 0 : i64, tpu.core_type = #tpu.core_type<tc>, window_params = [{pipeline_mode = #tpu.pipeline_mode<synchronous>, transform_indices = @transform_0, window_bounds = array<i64: 256, 256>}, {transform_indices = @transform_1, window_bounds = array<i64: 8, 256>}, {transform_indices = @transform_2, window_bounds = array<i64: 8, 128>}]} {
    %c0 = arith.constant 0 : index
    %c0_0 = arith.constant 0 : index
    %0 = vector.load %arg2[%c0, %c0_0] : memref<8x256xf32, #tpu.memory_space<vmem>>, vector<8x256xf32>
    %c0_1 = arith.constant 0 : index
    %c0_2 = arith.constant 0 : index
    %1 = vector.load %arg1[%c0_1, %c0_2] : memref<256x256xf32, #tpu.memory_space<vmem>>, vector<256x256xf32>
    %cst = arith.constant dense<0.000000e+00> : vector<8x256xf32>
    %2 = tpu.matmul %0, %1, %cst {dimension_numbers = #tpu.dot_dimension_numbers<[1], [0], [0], [1], [0, 0, 1, 1], [], []>} : vector<8x256xf32>, vector<256x256xf32>, vector<8x256xf32> -> vector<8x256xf32>
    %3 = vector.extract_strided_slice %2 {offsets = [0, 0], sizes = [8, 128], strides = [1, 1]} : vector<8x256xf32> to vector<8x128xf32>
    %4 = vector.extract_strided_slice %2 {offsets = [0, 128], sizes = [8, 128], strides = [1, 1]} : vector<8x256xf32> to vector<8x128xf32>
    %5 = arith.mulf %3, %3 : vector<8x128xf32>
    %6 = arith.mulf %4, %4 : vector<8x128xf32>
    %7 = arith.addf %5, %6 : vector<8x128xf32>
    %8 = math.sqrt %7 : vector<8x128xf32>
    %c0_3 = arith.constant 0 : index
    %c0_4 = arith.constant 0 : index
    %9 = vector.load %arg3[%c0_3, %c0_4] : memref<8x128xf32, #tpu.memory_space<vmem>>, vector<8x128xf32>
    tpu.vector_store %arg3[%c0_3, %c0_4], %8 {strides = array<i32>} : memref<8x128xf32, #tpu.memory_space<vmem>>, vector<8x128xf32>,
    return
  }
  func.func @transform_0(%arg0: i32) -> (i32, i32) {
    %c0_i32 = arith.constant 0 : i32
    %c0_i32_0 = arith.constant 0 : i32
    %c0_i32_1 = arith.constant 0 : i32
    return %c0_i32, %c0_i32_0 : i32, i32
  }
  func.func @transform_1(%arg0: i32) -> (i32, i32) {
    %c0_i32 = arith.constant 0 : i32
    %c0_i32_0 = arith.constant 0 : i32
    return %arg0, %c0_i32 : i32, i32
  }
  func.func @transform_2(%arg0: i32) -> (i32, i32) {
    %c0_i32 = arith.constant 0 : i32
    %c0_i32_0 = arith.constant 0 : i32
    return %arg0, %c0_i32 : i32, i32
  }
}

</mosaic_0001>

<bundles_post_ra>
// kernel: tpu_custom_call.1
= control target key start
LH: loop header
LB: loop body
LE: loop exit
PB: predicated region body
PF: predicated region fallthrough
CT: control target
= control target key end

     0   :  { %7 = vsyncpa [#allocation3], 0  ;;  %s304_s0 = inlined_call_operand.hbm [shape: f32[256,256], index: 0, kind: input, shape index: {}]   ;;  %s305_s1 = inlined_call_operand.hbm [shape: f32[8,256], index: 1, kind: input, shape index: {}]   ;;  %s306_s2 = inlined_call_operand.hbm [shape: f32[8,128], index: 2, kind: output, shape index: {}]  }
   0x1   :  { %8 = vsyncpa [#allocation6], 0 }
   0x2   :  { %9 = vsyncpa [#allocation4], 0  ;;  %s275_s9 = smov [#allocation2]  }
   0x3   :  { %s15_s10 = sshll.u32 %s275_s9, 4  ;;  %s16_s10 = int_to_ptr.vmem [resolvable:$true] %s15_s10 }
   0x4   :  { %s217_s11 = scalar_lea.vmem %s16_s10, 8192  ;;  %p222_p1 = scmp.lt.s32.totalorder %s16_s10, %s16_s10 }
   0x5   :  { %p218_p0 = scmp.ne.s32.totalorder %s16_s10, %s217_s11  ;;  %p223_p2 = scmp.lt.s32.totalorder %s217_s11, %s217_s11 }
   0x7   :  { %p224_p3 = por %p223_p2, %p222_p1 }
   0x9   :  { %p225_p4 = pnand %p224_p3, %p218_p0 }
   0xb   :  { %228 = shalt.err (!%p225_p4)
}
   0xc   :  { %s276_s12 = smov 256   ;;  %s277_s13 = smov 16  }
   0xd   :  { %21 = dma.hbm_to_vmem [thread:$0]  %s304_s0, 8192, %s16_s10, [#allocation3], %s276_s12, %s276_s12, %s277_s13  }
   0xe   :  { %s278_s16 = smov [#allocation5]  }
   0xf   :  { %s28_s17 = sshll.u32 %s278_s16, 4  ;;  %s29_s17 = int_to_ptr.vmem [resolvable:$true] %s28_s17 }
  0x10   :  { %s237_s18 = scalar_lea.vmem %s29_s17, 256  ;;  %p242_p6 = scmp.lt.s32.totalorder %s29_s17, %s29_s17 }
  0x11   :  { %p238_p5 = scmp.ne.s32.totalorder %s29_s17, %s237_s18  ;;  %p243_p7 = scmp.lt.s32.totalorder %s237_s18, %s237_s18 }
  0x13   :  { %p244_p8 = por %p243_p7, %p242_p6 }
  0x15   :  { %p245_p9 = pnand %p244_p8, %p238_p5 }
  0x17   :  { %248 = shalt.err (!%p245_p9)
}
  0x18   :  { %31 = dma.hbm_to_vmem [thread:$0]  %s305_s1, 256, %s29_s17, [#allocation6]  }
  0x19   :  { %269 = dma.done.wait [#allocation3], 8192  }
  0x1a   :  { %270 = vsyncadd [#allocation3], 4294959104 }
  0x1b   :  { %271 = dma.done.wait [#allocation6], 256  }
  0x1c   :  { %272 = vsyncadd [#allocation6], 4294967040  ;;  %v71_v0 = vld [vmem:[#allocation2 + $0xf8] sm:$0xff]  ;;  %v70_v1 = vld [vmem:[#allocation2 + $0xf0] sm:$0xff]  ;;  %s279_s0 = smov [#allocation7]  }
  0x1d   :  { %v69_v2 = vld [vmem:[#allocation2 + $0xe8] sm:$0xff]  ;;  %104 = vmatprep.subr.mxu0 %v71_v0  ;;  %v68_v3 = vld [vmem:[#allocation2 + $0xe0] sm:$0xff]  ;;  %v67_v4 = vld [vmem:[#allocation2 + $0xd8] sm:$0xff]  ;;  %s192_s1 = sshll.u32 %s279_s0, 4  ;;  %s193_s1 = int_to_ptr.vmem [resolvable:$true] %s192_s1 }
  0x1e   :  { %105 = vmatpush1.msra.mxu0 %v70_v1  ;;  %v66_v5 = vld [vmem:[#allocation2 + $0xd0] sm:$0xff]  ;;  %v65_v6 = vld [vmem:[#allocation2 + $0xc8] sm:$0xff]  ;;  %v64_v7 = vld [vmem:[#allocation2 + $0xc0] sm:$0xff]  ;;  %s249_s21 = scalar_lea.vmem %s193_s1, 128  ;;  %p254_p11 = scmp.lt.s32.totalorder %s193_s1, %s193_s1 }
  0x1f   :  { %106 = vmatprep.subr.mxu0 %v69_v2  ;;  %v63_v8 = vld [vmem:[#allocation2 + $0xb8] sm:$0xff]  ;;  %v62_v9 = vld [vmem:[#allocation2 + $0xb0] sm:$0xff]  ;;  %v61_v10 = vld [vmem:[#allocation2 + $0xa8] sm:$0xff]  ;;  %p250_p10 = scmp.ne.s32.totalorder %s193_s1, %s249_s21  ;;  %p255_p12 = scmp.lt.s32.totalorder %s249_s21, %s249_s21 }
  0x20   :  { %107 = vmatpush1.msra.mxu0 %v68_v3  ;;  %v60_v11 = vld [vmem:[#allocation2 + $0xa0] sm:$0xff]  ;;  %v59_v12 = vld [vmem:[#allocation2 + $0x98] sm:$0xff]  ;;  %v58_v13 = vld [vmem:[#allocation2 + $0x90] sm:$0xff] }
  0x21   :  { %108 = vmatprep.subr.mxu0 %v67_v4  ;;  %v57_v14 = vld [vmem:[#allocation2 + $0x88] sm:$0xff]  ;;  %v56_v15 = vld [vmem:[#allocation2 + $0x80] sm:$0xff]  ;;  %v55_v16 = vld [vmem:[#allocation2 + $0x78] sm:$0xff]  ;;  %p256_p13 = por %p255_p12, %p254_p11 }
  0x22   :  { %109 = vmatpush1.msra.mxu0 %v66_v5  ;;  %v54_v17 = vld [vmem:[#allocation2 + $0x70] sm:$0xff]  ;;  %v53_v18 = vld [vmem:[#allocation2 + $0x68] sm:$0xff]  ;;  %v52_v19 = vld [vmem:[#allocation2 + $0x60] sm:$0xff] }
  0x23   :  { %110 = vmatprep.subr.mxu0 %v65_v6  ;;  %v51_v20 = vld [vmem:[#allocation2 + $0x58] sm:$0xff]  ;;  %v50_v21 = vld [vmem:[#allocation2 + $0x50] sm:$0xff]  ;;  %v49_v22 = vld [vmem:[#allocation2 + $0x48] sm:$0xff]  ;;  %p257_p0 = pnand %p256_p13, %p250_p10 }
  0x24   :  { %111 = vmatpush1.msra.mxu0 %v64_v7  ;;  %v48_v23 = vld [vmem:[#allocation2 + $0x40] sm:$0xff]  ;;  %v39_v24 = vld [vmem:[#allocation5 + $0x8] sm:$0xff]  ;;  %v47_v25 = vld [vmem:[#allocation2 + $0x38] sm:$0xff] }
  0x25   :  { %112 = vmatprep.subr.mxu0 %v63_v8  ;;  %168 = vmatprep.mubr.f32.mxu0 %v39_v24  ;;  %v46_v26 = vld [vmem:[#allocation2 + $0x30] sm:$0xff]  ;;  %v45_v27 = vld [vmem:[#allocation2 + $0x28] sm:$0xff]  ;;  %v44_v28 = vld [vmem:[#allocation2 + $0x20] sm:$0xff] }
  0x26   :  { %113 = vmatpush1.msra.mxu0 %v62_v9  ;;  %v43_v29 = vld [vmem:[#allocation2 + $0x18] sm:$0xff]  ;;  %v42_v30 = vld [vmem:[#allocation2 + $0x10] sm:$0xff]  ;;  %v41_v31 = vld [vmem:[#allocation2 + $0x8] sm:$0xff] }
  0x27   :  { %114 = vmatprep.subr.mxu0 %v61_v10  ;;  %v40_v32 = vld [vmem:[#allocation2] sm:$0xff]  ;;  %v103_v33 = vld [vmem:[#allocation2 + $0x1f8] sm:$0xff]  ;;  %v102_v34 = vld [vmem:[#allocation2 + $0x1f0] sm:$0xff] }
  0x28   :  { %115 = vmatpush1.msra.mxu0 %v60_v11  ;;  %v101_v35 = vld [vmem:[#allocation2 + $0x1e8] sm:$0xff]  ;;  %v100_v36 = vld [vmem:[#allocation2 + $0x1e0] sm:$0xff]  ;;  %v99_v37 = vld [vmem:[#allocation2 + $0x1d8] sm:$0xff] }
  0x29   :  { %116 = vmatprep.subr.mxu0 %v59_v12  ;;  %v98_v38 = vld [vmem:[#allocation2 + $0x1d0] sm:$0xff]  ;;  %v97_v39 = vld [vmem:[#allocation2 + $0x1c8] sm:$0xff]  ;;  %v96_v40 = vld [vmem:[#allocation2 + $0x1c0] sm:$0xff] }
  0x2a   :  { %117 = vmatpush1.msra.mxu0 %v58_v13  ;;  %v95_v41 = vld [vmem:[#allocation2 + $0x1b8] sm:$0xff]  ;;  %v94_v42 = vld [vmem:[#allocation2 + $0x1b0] sm:$0xff]  ;;  %v93_v43 = vld [vmem:[#allocation2 + $0x1a8] sm:$0xff] }
  0x2b   :  { %118 = vmatprep.subr.mxu0 %v57_v14  ;;  %v92_v44 = vld [vmem:[#allocation2 + $0x1a0] sm:$0xff]  ;;  %v91_v45 = vld [vmem:[#allocation2 + $0x198] sm:$0xff]  ;;  %v90_v46 = vld [vmem:[#allocation2 + $0x190] sm:$0xff] }
  0x2c   :  { %119 = vmatpush1.msra.mxu0 %v56_v15  ;;  %v89_v47 = vld [vmem:[#allocation2 + $0x188] sm:$0xff]  ;;  %v88_v48 = vld [vmem:[#allocation2 + $0x180] sm:$0xff]  ;;  %v87_v49 = vld [vmem:[#allocation2 + $0x178] sm:$0xff] }
  0x2d   :  { %120 = vmatprep.subr.mxu0 %v55_v16  ;;  %v86_v50 = vld [vmem:[#allocation2 + $0x170] sm:$0xff]  ;;  %v85_v51 = vld [vmem:[#allocation2 + $0x168] sm:$0xff]  ;;  %v84_v52 = vld [vmem:[#allocation2 + $0x160] sm:$0xff] }
  0x2e   :  { %121 = vmatpush1.msra.mxu0 %v54_v17  ;;  %v83_v53 = vld [vmem:[#allocation2 + $0x158] sm:$0xff]  ;;  %v82_v54 = vld [vmem:[#allocation2 + $0x150] sm:$0xff]  ;;  %v81_v55 = vld [vmem:[#allocation2 + $0x148] sm:$0xff] }
  0x2f   :  { %122 = vmatprep.subr.mxu0 %v53_v18  ;;  %v80_v56 = vld [vmem:[#allocation2 + $0x140] sm:$0xff]  ;;  %v79_v57 = vld [vmem:[#allocation2 + $0x138] sm:$0xff]  ;;  %v78_v58 = vld [vmem:[#allocation2 + $0x130] sm:$0xff] }
  0x30   :  { %123 = vmatpush1.msra.mxu0 %v52_v19  ;;  %v77_v59 = vld [vmem:[#allocation2 + $0x128] sm:$0xff]  ;;  %v76_v60 = vld [vmem:[#allocation2 + $0x120] sm:$0xff]  ;;  %v75_v61 = vld [vmem:[#allocation2 + $0x118] sm:$0xff] }
  0x31   :  { %124 = vmatprep.subr.mxu0 %v51_v20  ;;  %v74_v62 = vld [vmem:[#allocation2 + $0x110] sm:$0xff]  ;;  %v73_v63 = vld [vmem:[#allocation2 + $0x108] sm:$0xff]  ;;  %v72_v0 = vld [vmem:[#allocation2 + $0x100] sm:$0xff] }
  0x32   :  { %125 = vmatpush1.msra.mxu0 %v50_v21  ;;  %v38_v1 = vld [vmem:[#allocation5] sm:$0xff] }
  0x33   :  { %126 = vmatprep.subr.mxu0 %v49_v22 }
  0x34   :  { %127 = vmatpush1.msra.mxu0 %v48_v23 }
  0x35   :  { %128 = vmatprep.subr.mxu0 %v47_v25 }
  0x36   :  { %129 = vmatpush1.msra.mxu0 %v46_v26 }
  0x37   :  { %130 = vmatprep.subr.mxu0 %v45_v27 }
  0x38   :  { %131 = vmatpush1.msra.mxu0 %v44_v28 }
  0x39   :  { %132 = vmatprep.subr.mxu0 %v43_v29 }
  0x3a   :  { %133 = vmatpush1.msra.mxu0 %v42_v30 }
  0x3b   :  { %134 = vmatprep.subr.mxu0 %v41_v31 }
  0x3c   :  { %135 = vmatpush1.msra.mxu0 %v40_v32 }
  0x3d   :  { %136 = vmatprep.subr.mxu0 %v103_v33 }
  0x3e   :  { %137 = vmatpush2.msra.mxu0 %v102_v34 }
  0x3f   :  { %138 = vmatprep.subr.mxu0 %v101_v35 }
  0x40   :  { %139 = vmatpush2.msra.mxu0 %v100_v36 }
  0x41   :  { %140 = vmatprep.subr.mxu0 %v99_v37 }
  0x42   :  { %141 = vmatpush2.msra.mxu0 %v98_v38 }
  0x43   :  { %142 = vmatprep.subr.mxu0 %v97_v39 }
  0x44   :  { %143 = vmatpush2.msra.mxu0 %v96_v40 }
  0x45   :  { %144 = vmatprep.subr.mxu0 %v95_v41 }
  0x46   :  { %145 = vmatpush2.msra.mxu0 %v94_v42 }
  0x47   :  { %146 = vmatprep.subr.mxu0 %v93_v43 }
  0x48   :  { %147 = vmatpush2.msra.mxu0 %v92_v44 }
  0x49   :  { %148 = vmatprep.subr.mxu0 %v91_v45 }
  0x4a   :  { %149 = vmatpush2.msra.mxu0 %v90_v46 }
  0x4b   :  { %150 = vmatprep.subr.mxu0 %v89_v47 }
  0x4c   :  { %151 = vmatpush2.msra.mxu0 %v88_v48 }
  0x4d   :  { %152 = vmatprep.subr.mxu0 %v87_v49 }
  0x4e   :  { %153 = vmatpush2.msra.mxu0 %v86_v50 }
  0x4f   :  { %154 = vmatprep.subr.mxu0 %v85_v51 }
  0x50   :  { %155 = vmatpush2.msra.mxu0 %v84_v52 }
  0x51   :  { %156 = vmatprep.subr.mxu0 %v83_v53 }
  0x52   :  { %157 = vmatpush2.msra.mxu0 %v82_v54 }
  0x53   :  { %158 = vmatprep.subr.mxu0 %v81_v55 }
  0x54   :  { %159 = vmatpush2.msra.mxu0 %v80_v56 }
  0x55   :  { %160 = vmatprep.subr.mxu0 %v79_v57 }
  0x56   :  { %161 = vmatpush2.msra.mxu0 %v78_v58 }
  0x57   :  { %162 = vmatprep.subr.mxu0 %v77_v59 }
  0x58   :  { %163 = vmatpush2.msra.mxu0 %v76_v60 }
  0x59   :  { %164 = vmatprep.subr.mxu0 %v75_v61 }
  0x5a   :  { %165 = vmatpush2.msra.mxu0 %v74_v62 }
  0x5b   :  { %166 = vmatprep.subr.mxu0 %v73_v63 }
  0x5c   :  { %167 = vmatpush2.msra.mxu0 %v72_v0 }
  0x5d   :  { %169 = vmatmul.mubr.f32.vlgmr.msra.gmra.mxu0 %v38_v1 }
 0x11d   :  { %v170_v2 = vpop.f32.mrf.mxu0 }
 0x11e   :  { %v175_v4 = vmul.f32 %v170_v2, %v170_v2 }
 0x11f   :  { %v172_v3 = vpop.f32.mrf.mxu0 }
 0x120   :  { %v176_v5 = vmul.f32 %v172_v3, %v172_v3 }
 0x122   :  { %v177_v6 = vadd.f32 %v176_v5, %v175_v4 }
 0x124   :  { %207 = vrsqrt.f32 %v177_v6  ;;  %vm180_vm0 = vcmp.eq.f32.partialorder %v177_v6, inf  ;;  %v183_v9 = vand.u32 2147483648, %v177_v6  ;;  %vm182_vm1 = vcmp.eq.f32.partialorder %v177_v6, 0.0 }
 0x131   :  { %v208_v7 = vpop.eup %207 }
 0x132   :  { %v179_v8 = vmul.f32 %v208_v7, %v177_v6 }
 0x134   :  { %v181_v10 = vsel %vm180_vm0, %v177_v6, %v179_v8 }
 0x135   :  { %v184_v11 = vsel %vm182_vm1, %v183_v9, %v181_v10 }
 0x136   :  { %185 = vst [vmem:[#allocation7] sm:$0xff] %v184_v11 }
 0x137   :  { %260 = shalt.err (!%p257_p0)
}
 0x138   :  { %195 = dma.vmem_to_hbm [thread:$0]  %s193_s1, 128, %s306_s2, [#allocation4]  }
 0x139   :  { %273 = dma.done.wait [#allocation4], 128  }
 0x13a   :  { %274 = vsyncadd [#allocation4], 4294967168 }
 0x13b   :  { %199 = vsyncpa [#allocation3], 1 }
 0x13c   :  { %200 = vsyncpa [#allocation6], 1 }
 0x13d   :  { %201 = vsyncpa [#allocation4], 1 }

</bundles_post_ra>
